<compile_context>
chip_gen: v7x
topology: tpu7x:2x2x1
jax: 0.10.0
libtpu: 0.0.40
codegen_flags: <defaults>
</compile_context>

<pallas_src>
import math

import jax
import jax.numpy as jnp
from jax import lax
from jax.experimental import pallas as pl
from jax.experimental.pallas import tpu as pltpu

_SENTINEL = 2.0 ** 20   # bf16/f32-exact, never equal to a class id in [0, 256)


def _is_small_int_gamma(gamma):
    g = float(gamma)
    return g.is_integer() and 0.0 <= g <= 8.0


def _pow_gamma(x, gamma):
    """x ** gamma: repeated VPU multiplies for small non-negative integers."""
    if _is_small_int_gamma(gamma):
        n = int(gamma)
        if n == 0:
            return jnp.ones_like(x)
        out = x
        for _ in range(n - 1):
            out = out * x
        return out
    # Non-integer gamma: clamp so bf16 probs rounding slightly above 1.0
    # cannot produce NaN; falls back to pow (EUP exp/log).
    return jnp.maximum(x, 0.0) ** gamma


def _make_kernel(*, packed, gamma, ignore_index, eps, num_rows, tile, sub):
    """Kernel emitting per-lane partial numerator / denominator-count sums."""
    n_sub = tile // sub

    def _strip(x_ref, t_ref, cls_ref, expand_ref, num_acc, den_acc, base, r0):
        x = x_ref[pl.ds(r0, sub), :].astype(jnp.float32)            # (sub, W)
        t = t_ref[pl.ds(r0, sub), :].astype(jnp.int32)              # (sub, G)
        # Row validity (partial last grid block) is folded into the target
        # sentinel on the narrow (sub, G) tensor -- no full-(sub, W) index math.
        local = lax.broadcasted_iota(jnp.int32, (sub, 1), 0)
        bad = (t == ignore_index) | ((base + r0 + local) >= num_rows)
        t_f = jnp.where(bad, jnp.float32(_SENTINEL), t.astype(jnp.float32))
        if packed:
            # One default-precision bf16 MXU pass broadcasts each sample's
            # target id across its C lanes (exact for ids < 256 / sentinel).
            t_lane = jnp.dot(t_f.astype(jnp.bfloat16), expand_ref[...],
                             preferred_element_type=jnp.float32)     # (sub, W)
        else:
            t_lane = t_f                                             # (sub, 1)
        onehot = t_lane == cls_ref[...]                              # (sub, W)
        # NOTE: targets outside [0, C) other than ignore_index simply never
        # match a lane and are dropped from numerator AND denominator
        # (PyTorch's one_hot would raise instead).
        focal = 1.0 - x
        val = _pow_gamma(focal, gamma) * (-jnp.log(eps + x))
        # select (not multiply) so garbage/NaN from masked lanes cannot leak.
        num_acc[...] += jnp.sum(jnp.where(onehot, val, 0.0),
                                axis=0, keepdims=True)
        den_acc[...] += jnp.sum(onehot.astype(jnp.float32),
                                axis=0, keepdims=True)

    def kernel(x_ref, t_ref, cls_ref, *rest):
        if packed:
            expand_ref, num_ref, den_ref, num_acc, den_acc = rest
        else:
            expand_ref = None
            num_ref, den_ref, num_acc, den_acc = rest
        base = pl.program_id(0) * tile
        num_acc[...] = jnp.zeros_like(num_acc)
        den_acc[...] = jnp.zeros_like(den_acc)
        if n_sub == 1:
            _strip(x_ref, t_ref, cls_ref, expand_ref, num_acc, den_acc, base, 0)
        else:
            # Strip-mine: bounds the f32 elementwise chain to (sub, W) live
            # ranges instead of block-sized temporaries.
            def body(s, carry):
                _strip(x_ref, t_ref, cls_ref, expand_ref, num_acc, den_acc,
                       base, pl.multiple_of(s * sub, sub))
                return carry
            lax.fori_loop(0, n_sub, body, 0)
        num_ref[0] = num_acc[...]
        den_ref[0] = den_acc[...]

    return kernel


def _tail_num_den(x_t, t_t, cw, num_classes, gamma, ignore_index, eps):
    """Pure-JAX numerator/denominator for the < group-sample tail."""
    x_t = x_t.astype(jnp.float32)
    t_t = t_t.astype(jnp.int32)
    in_range = (t_t != ignore_index) & (t_t >= 0) & (t_t < num_classes)
    tc = jnp.where(in_range, t_t, 0)
    onehot = jax.nn.one_hot(tc, num_classes, dtype=jnp.float32)
    onehot = onehot * in_range[:, None].astype(jnp.float32)
    pt = jnp.sum(onehot * x_t, axis=-1)
    if cw is None:
        w = in_range.astype(jnp.float32)
    else:
        w = jnp.sum(onehot * cw[None, :], axis=-1)
    loss = w * _pow_gamma(1.0 - pt, gamma) * (-jnp.log(eps + pt))
    return loss.sum(), w.sum()


def focal_loss(x, target, class_weights=None, *, gamma=2, reduction="mean",
               ignore_index=-100, eps=1e-16, block_bytes=4 << 20,
               strip_rows=None):
    """Focal loss matching the PyTorch module. x: (..., C) probs, target: (...)."""
    if reduction not in ("mean", "sum"):
        # TODO(synk): reduction='none' needs a per-sample output spec; not wired up.
        raise NotImplementedError(f"reduction={reduction!r} not implemented")

    if x.ndim == 1:  # binary case: the module stacks [1 - p, p]
        x = jnp.stack([1.0 - x, x], axis=-1)

    num_classes = x.shape[-1]
    n = x.size // num_classes
    x2d = x.reshape(n, num_classes)
    t_flat = target.reshape(-1)
    # Narrow targets: halves their HBM traffic and VMEM padding vs int32.
    if num_classes <= 32767 and -32768 <= ignore_index <= 32767:
        t_flat = t_flat.astype(jnp.int16)
    else:
        t_flat = t_flat.astype(jnp.int32)

    # --- Generalized lane packing: fold `group` consecutive samples into one
    #     128-lane-aligned row of width lcm(C, 128), for any C <= 256. ---
    group = 1
    if num_classes <= 256:
        g = 128 // math.gcd(num_classes, 128)          # width = lcm(C, 128)
        if g * num_classes <= 32768 and n >= g:
            group = g
    width = group * num_classes
    rows = max(1, n // group)
    n_main = rows * group

    # Tail (n % group samples) handled by a tiny pure-JAX epilogue.
    # TODO(synk): when a tail exists the prefix slice below may materialize a
    # copy of x in HBM; shapes with n % group == 0 avoid it entirely.
    if n_main < n:
        x_main, x_tail = x2d[:n_main], x2d[n_main:]
        t_main, t_tail = t_flat[:n_main], t_flat[n_main:]
    else:
        x_main, x_tail, t_main, t_tail = x2d, None, t_flat, None

    x_k = x_main.reshape(rows, width)        # native dtype, free reshape
    t_k = t_main.reshape(rows, group)

    # --- tile / strip selection ---
    itemsize = jnp.dtype(x.dtype).itemsize
    width_pad = pl.cdiv(width, 128) * 128
    x_row_vmem = width_pad * itemsize
    if rows < 8:
        tile = sub = rows                    # full-dim block, single strip
    else:
        sub = ((256 << 10) // (width_pad * 4)) // 8 * 8   # ~256 KiB f32 strips
        if strip_rows is not None:
            sub = strip_rows // 8 * 8
        sub = max(8, min(512, sub))
        if rows < sub:
            sub = rows // 8 * 8
            tile = sub
        else:
            want = max(sub, int(block_bytes) // x_row_vmem)
            tile = min(want // sub * sub, rows // sub * sub)
            # keep >= 2 blocks so the 'parallel' axis can use a second core
            if pl.cdiv(rows, tile) == 1 and tile >= 2 * sub:
                tile = pl.cdiv(pl.cdiv(rows, 2), sub) * sub
    num_blocks = pl.cdiv(rows, tile)

    # --- VMEM budget: double-buffered inputs + 128-lane-padded targets +
    #     in-kernel f32 temporaries (per strip) + accumulators + headroom. ---
    t_itemsize = jnp.dtype(t_k.dtype).itemsize
    x_blk = tile * width_pad * itemsize
    t_blk = tile * 128 * t_itemsize
    const_blk = width_pad * 4 + (group * width_pad * 2 if group > 1 else 0)
    out_blk = 2 * 8 * width_pad * 4
    acc_blk = 2 * 8 * width_pad * 4
    temps = 8 * sub * width_pad * 4
    vmem_need = 2 * (x_blk + t_blk + const_blk + out_blk) + acc_blk + temps + (2 << 20)
    vmem_limit = int(min(max(vmem_need, 4 << 20), 48 << 20))

    # Host-side constants: class-of-lane and the lane-broadcast selector.
    cls = (jnp.arange(width, dtype=jnp.int32) % num_classes
           ).astype(jnp.float32).reshape(1, width)
    inputs = [x_k, t_k, cls]
    in_specs = [
        pl.BlockSpec((tile, width), lambda i: (i, 0)),     # packed probs
        pl.BlockSpec((tile, group), lambda i: (i, 0)),     # int16 targets
        pl.BlockSpec((1, width), lambda i: (0, 0)),        # class-of-lane
    ]
    if group > 1:
        expand = ((jnp.arange(width, dtype=jnp.int32) // num_classes)[None, :]
                  == jnp.arange(group, dtype=jnp.int32)[:, None]
                  ).astype(jnp.bfloat16)                   # (group, width)
        inputs.append(expand)
        in_specs.append(pl.BlockSpec((group, width), lambda i: (0, 0)))

    kernel = _make_kernel(packed=(group > 1), gamma=gamma,
                          ignore_index=ignore_index, eps=float(eps),
                          num_rows=rows, tile=tile, sub=sub)

    num_out, den_out = pl.pallas_call(
        kernel,
        out_shape=(jax.ShapeDtypeStruct((num_blocks, 1, width), jnp.float32),
                   jax.ShapeDtypeStruct((num_blocks, 1, width), jnp.float32)),
        grid_spec=pltpu.PrefetchScalarGridSpec(
            num_scalar_prefetch=0,
            grid=(num_blocks,),
            in_specs=in_specs,
            out_specs=[pl.BlockSpec((1, 1, width), lambda i: (i, 0, 0)),
                       pl.BlockSpec((1, 1, width), lambda i: (i, 0, 0))],
            scratch_shapes=[pltpu.VMEM((1, width), jnp.float32),
                            pltpu.VMEM((1, width), jnp.float32)]),
        compiler_params=pltpu.CompilerParams(
            dimension_semantics=("parallel",),
            vmem_limit_bytes=vmem_limit),
    )(*inputs)

    # --- epilogue: class weights applied to tiny per-lane partials only. ---
    num_lane = num_out.sum(axis=(0, 1))                    # (width,)
    den_lane = den_out.sum(axis=(0, 1))
    if class_weights is not None:
        cw = class_weights.reshape(-1).astype(jnp.float32)
        cw_lanes = jnp.tile(cw, group)
        num = jnp.sum(num_lane * cw_lanes)
        den = jnp.sum(den_lane * cw_lanes)
    else:
        cw = None
        num = jnp.sum(num_lane)
        den = jnp.sum(den_lane)

    if x_tail is not None:
        tn, td = _tail_num_den(x_tail, t_tail, cw, num_classes, gamma,
                               ignore_index, float(eps))
        num = num + tn
        den = den + td

    if reduction == "sum":
        return num
    # NOTE: NaN/Inf if every target is ignored -- same as the PyTorch reference.
    return num / den


def focal_loss_ref(x, target, class_weights=None, gamma=2, ignore_index=-100,
                   eps=1e-16):
    """Pure-JAX reference mirroring the PyTorch module (reduction='mean')."""
    C = x.shape[-1]
    x2 = x.reshape(-1, C).astype(jnp.float32)
    t = target.reshape(-1)
    mask = t == ignore_index
    tc = jnp.where(mask, 0, t)
    onehot = jax.nn.one_hot(tc, C, dtype=x2.dtype)
    if class_weights is None:
        w = jnp.ones((t.shape[0],), jnp.float32)
    else:
        w = (onehot * class_weights[None, :].astype(jnp.float32)).sum(-1)
    pt = (onehot * x2).sum(-1) * (~mask)
    nll = jnp.where(mask, 0.0, -jnp.log(eps + pt))
    loss = w * (1.0 - pt) ** gamma * nll
    return loss.sum() / ((~mask) * w).sum()


if __name__ == "__main__":
    key = jax.random.PRNGKey(0)
    ks = jax.random.split(key, 8)

    # --- Case 1: C=8 (packed: group=16, width=128), f32 probs, per-class
    #             weights, n=128 -> 8 packed rows, single block. ---
    B, S, C = 2, 64, 8
    x = jax.nn.softmax(jax.random.normal(ks[0], (B, S, C), jnp.float32), -1)
    t = jax.random.randint(ks[1], (B, S), 0, C, jnp.int32)
    t = jnp.where(jax.random.uniform(ks[2], (B, S)) < 0.1, -100, t)
    w = jnp.linspace(0.5, 1.5, C, dtype=jnp.float32)
    out = jax.block_until_ready(focal_loss(x, t, w))
    ref = focal_loss_ref(x, t, w)
    assert jnp.isfinite(out), out
    assert jnp.allclose(out, ref, rtol=1e-5, atol=1e-6), (out, ref)

    # --- Case 2: C=10 (generalized packing: group=64, width=640), bf16 probs,
    #             no weights, n=600 -> 9 packed rows (2 blocks, masked partial
    #             last block) + a 24-sample JAX tail epilogue. ---
    B2, S2, C2 = 2, 300, 10
    xb = jax.nn.softmax(jax.random.normal(ks[3], (B2, S2, C2), jnp.float32),
                        -1).astype(jnp.bfloat16)
    tb = jax.random.randint(ks[4], (B2, S2), 0, C2, jnp.int32)
    tb = jnp.where(jax.random.uniform(ks[5], (B2, S2)) < 0.15, -100, tb)
    out2 = jax.block_until_ready(focal_loss(xb, tb, None))
    ref2 = focal_loss_ref(xb, tb, None)
    assert jnp.isfinite(out2), out2
    assert jnp.allclose(out2, ref2, rtol=2e-5, atol=1e-6), (out2, ref2)

    # --- Case 3: C=8, n=4096 -> 256 packed rows; small block_bytes +
    #             strip_rows force a multi-block 'parallel' grid with an
    #             in-kernel strip loop (2 strips per 128-row block). ---
    B3, S3, C3 = 2, 2048, 8
    x3 = jax.nn.softmax(jax.random.normal(ks[6], (B3, S3, C3), jnp.float32), -1)
    t3 = jax.random.randint(ks[7], (B3, S3), 0, C3, jnp.int32)
    t3 = jnp.where(jax.random.uniform(ks[2], (B3, S3)) < 0.05, -100, t3)
    out3 = jax.block_until_ready(
        focal_loss(x3, t3, w, block_bytes=64 << 10, strip_rows=64))
    ref3 = focal_loss_ref(x3, t3, w)
    assert jnp.isfinite(out3), out3
    assert jnp.allclose(out3, ref3, rtol=5e-5, atol=1e-6), (out3, ref3)

    print("KERNEL_OK")
</pallas_src>

<mosaic_0001>
module attributes {stable_mosaic.version = 11 : i64} {
  func.func @kernel(%arg0: i32, %arg1: memref<8x128xf32, #tpu.memory_space<vmem>>, %arg2: memref<8x16xi16, #tpu.memory_space<vmem>>, %arg3: memref<1x128xf32, #tpu.memory_space<vmem>>, %arg4: memref<16x128xbf16, #tpu.memory_space<vmem>>, %arg5: memref<1x1x128xf32, #tpu.memory_space<vmem>>, %arg6: memref<1x1x128xf32, #tpu.memory_space<vmem>>, %arg7: memref<1x128xf32, #tpu.memory_space<vmem>>, %arg8: memref<1x128xf32, #tpu.memory_space<vmem>>) attributes {dimension_semantics = [#tpu.dimension_semantics<parallel>], iteration_bounds = array<i64: 1>, scalar_prefetch = 0 : i64, scratch_operands = 2 : i64, tpu.core_type = #tpu.core_type<tc>, window_params = [{transform_indices = @transform_0, window_bounds = array<i64: 8, 128>}, {transform_indices = @transform_1, window_bounds = array<i64: 8, 16>}, {pipeline_mode = #tpu.pipeline_mode<synchronous>, transform_indices = @transform_2, window_bounds = array<i64: 1, 128>}, {pipeline_mode = #tpu.pipeline_mode<synchronous>, transform_indices = @transform_3, window_bounds = array<i64: 16, 128>}, {transform_indices = @transform_4, window_bounds = array<i64: 1, 1, 128>}, {transform_indices = @transform_5, window_bounds = array<i64: 1, 1, 128>}]} {
    %c8_i32 = arith.constant 8 : i32
    %0 = arith.muli %arg0, %c8_i32 : i32
    %cst = arith.constant 0.000000e+00 : f32
    %1 = vector.broadcast %cst : f32 to vector<1x128xf32>
    %c0 = arith.constant 0 : index
    %c0_0 = arith.constant 0 : index
    %2 = vector.load %arg7[%c0, %c0_0] : memref<1x128xf32, #tpu.memory_space<vmem>>, vector<1x128xf32>
    tpu.vector_store %arg7[%c0, %c0_0], %1 {strides = array<i32>} : memref<1x128xf32, #tpu.memory_space<vmem>>, vector<1x128xf32>,
    %cst_1 = arith.constant 0.000000e+00 : f32
    %3 = vector.broadcast %cst_1 : f32 to vector<1x128xf32>
    %c0_2 = arith.constant 0 : index
    %c0_3 = arith.constant 0 : index
    %4 = vector.load %arg8[%c0_2, %c0_3] : memref<1x128xf32, #tpu.memory_space<vmem>>, vector<1x128xf32>
    tpu.vector_store %arg8[%c0_2, %c0_3], %3 {strides = array<i32>} : memref<1x128xf32, #tpu.memory_space<vmem>>, vector<1x128xf32>,
    %c0_4 = arith.constant 0 : index
    %c0_5 = arith.constant 0 : index
    %5 = vector.load %arg1[%c0_4, %c0_5] : memref<8x128xf32, #tpu.memory_space<vmem>>, vector<8x128xf32>
    %c0_6 = arith.constant 0 : index
    %c0_7 = arith.constant 0 : index
    %6 = vector.load %arg2[%c0_6, %c0_7] : memref<8x16xi16, #tpu.memory_space<vmem>>, vector<8x16xi16>
    %7 = arith.extsi %6 : vector<8x16xi16> to vector<8x16xi32>
    %8 = tpu.iota {dimensions = array<i32: 0>} : vector<8x1xi32>
    %c-100_i32 = arith.constant -100 : i32
    %9 = vector.broadcast %c-100_i32 : i32 to vector<8x16xi32>
    %10 = arith.cmpi eq, %7, %9 : vector<8x16xi32>
    %c0_i32 = arith.constant 0 : i32
    %11 = arith.addi %0, %c0_i32 : i32
    %12 = vector.broadcast %11 : i32 to vector<8x1xi32>
    %13 = arith.addi %12, %8 : vector<8x1xi32>
    %c8_i32_8 = arith.constant 8 : i32
    %14 = vector.broadcast %c8_i32_8 : i32 to vector<8x1xi32>
    %15 = arith.cmpi sge, %13, %14 : vector<8x1xi32>
    %16 = vector.broadcast %15 : vector<8x1xi1> to vector<8x16xi1>
    %17 = arith.ori %10, %16 : vector<8x16xi1>
    %18 = arith.sitofp %7 : vector<8x16xi32> to vector<8x16xf32>
    %cst_9 = arith.constant 0x49800000 : f32
    %19 = vector.broadcast %cst_9 : f32 to vector<8x16xf32>
    %20 = arith.select %17, %19, %18 : vector<8x16xi1>, vector<8x16xf32>
    %21 = arith.truncf %20 : vector<8x16xf32> to vector<8x16xbf16>
    %c0_10 = arith.constant 0 : index
    %c0_11 = arith.constant 0 : index
    %22 = vector.load %arg4[%c0_10, %c0_11] : memref<16x128xbf16, #tpu.memory_space<vmem>>, vector<16x128xbf16>
    %cst_12 = arith.constant dense<0.000000e+00> : vector<8x128xf32>
    %23 = tpu.matmul %21, %22, %cst_12 {dimension_numbers = #tpu.dot_dimension_numbers<[1], [0], [0], [1], [0, 0, 1, 1], [], []>} : vector<8x16xbf16>, vector<16x128xbf16>, vector<8x128xf32> -> vector<8x128xf32>
    %c0_13 = arith.constant 0 : index
    %c0_14 = arith.constant 0 : index
    %24 = vector.load %arg3[%c0_13, %c0_14] : memref<1x128xf32, #tpu.memory_space<vmem>>, vector<1x128xf32>
    %25 = vector.broadcast %24 : vector<1x128xf32> to vector<8x128xf32>
    %26 = arith.cmpf oeq, %23, %25 : vector<8x128xf32>
    %cst_15 = arith.constant 1.000000e+00 : f32
    %27 = vector.broadcast %cst_15 : f32 to vector<8x128xf32>
    %28 = arith.subf %27, %5 : vector<8x128xf32>
    %29 = arith.mulf %28, %28 : vector<8x128xf32>
    %cst_16 = arith.constant 1.000000e-16 : f32
    %30 = vector.broadcast %cst_16 : f32 to vector<8x128xf32>
    %31 = arith.addf %30, %5 : vector<8x128xf32>
    %32 = math.log %31 : vector<8x128xf32>
    %cst_17 = arith.constant 0.000000e+00 : f32
    %33 = vector.broadcast %cst_17 : f32 to vector<8x128xf32>
    %34 = arith.subf %33, %32 : vector<8x128xf32>
    %35 = arith.mulf %29, %34 : vector<8x128xf32>
    %c0_18 = arith.constant 0 : index
    %c0_19 = arith.constant 0 : index
    %36 = vector.load %arg7[%c0_18, %c0_19] : memref<1x128xf32, #tpu.memory_space<vmem>>, vector<1x128xf32>
    %cst_20 = arith.constant 0.000000e+00 : f32
    %37 = vector.broadcast %cst_20 : f32 to vector<8x128xf32>
    %38 = arith.select %26, %35, %37 : vector<8x128xi1>, vector<8x128xf32>
    %cst_21 = arith.constant dense<0.000000e+00> : vector<128xf32>
    %39 = vector.multi_reduction <add>, %38, %cst_21 [0] : vector<8x128xf32> to vector<128xf32>
    %40 = vector.shape_cast %39 : vector<128xf32> to vector<1x128xf32>
    %41 = arith.addf %36, %40 : vector<1x128xf32>
    %c0_22 = arith.constant 0 : index
    %c0_23 = arith.constant 0 : index
    %42 = vector.load %arg7[%c0_22, %c0_23] : memref<1x128xf32, #tpu.memory_space<vmem>>, vector<1x128xf32>
    tpu.vector_store %arg7[%c0_22, %c0_23], %41 {strides = array<i32>} : memref<1x128xf32, #tpu.memory_space<vmem>>, vector<1x128xf32>,
    %c0_24 = arith.constant 0 : index
    %c0_25 = arith.constant 0 : index
    %43 = vector.load %arg8[%c0_24, %c0_25] : memref<1x128xf32, #tpu.memory_space<vmem>>, vector<1x128xf32>
    %44 = arith.extui %26 : vector<8x128xi1> to vector<8x128xi32>
    %45 = arith.sitofp %44 : vector<8x128xi32> to vector<8x128xf32>
    %cst_26 = arith.constant dense<0.000000e+00> : vector<128xf32>
    %46 = vector.multi_reduction <add>, %45, %cst_26 [0] : vector<8x128xf32> to vector<128xf32>
    %47 = vector.shape_cast %46 : vector<128xf32> to vector<1x128xf32>
    %48 = arith.addf %43, %47 : vector<1x128xf32>
    %c0_27 = arith.constant 0 : index
    %c0_28 = arith.constant 0 : index
    %49 = vector.load %arg8[%c0_27, %c0_28] : memref<1x128xf32, #tpu.memory_space<vmem>>, vector<1x128xf32>
    tpu.vector_store %arg8[%c0_27, %c0_28], %48 {strides = array<i32>} : memref<1x128xf32, #tpu.memory_space<vmem>>, vector<1x128xf32>,
    %c0_29 = arith.constant 0 : index
    %c0_30 = arith.constant 0 : index
    %50 = vector.load %arg7[%c0_29, %c0_30] : memref<1x128xf32, #tpu.memory_space<vmem>>, vector<1x128xf32>
    %c0_31 = arith.constant 0 : index
    %c0_32 = arith.constant 0 : index
    %c0_33 = arith.constant 0 : index
    %51 = vector.load %arg5[%c0_31, %c0_32, %c0_33] : memref<1x1x128xf32, #tpu.memory_space<vmem>>, vector<1x1x128xf32>
    %52 = vector.shape_cast %51 : vector<1x1x128xf32> to vector<1x128xf32>
    %53 = vector.shape_cast %50 : vector<1x128xf32> to vector<1x1x128xf32>
    tpu.vector_store %arg5[%c0_31, %c0_32, %c0_33], %53 {strides = array<i32>} : memref<1x1x128xf32, #tpu.memory_space<vmem>>, vector<1x1x128xf32>,
    %c0_34 = arith.constant 0 : index
    %c0_35 = arith.constant 0 : index
    %54 = vector.load %arg8[%c0_34, %c0_35] : memref<1x128xf32, #tpu.memory_space<vmem>>, vector<1x128xf32>
    %c0_36 = arith.constant 0 : index
    %c0_37 = arith.constant 0 : index
    %c0_38 = arith.constant 0 : index
    %55 = vector.load %arg6[%c0_36, %c0_37, %c0_38] : memref<1x1x128xf32, #tpu.memory_space<vmem>>, vector<1x1x128xf32>
    %56 = vector.shape_cast %55 : vector<1x1x128xf32> to vector<1x128xf32>
    %57 = vector.shape_cast %54 : vector<1x128xf32> to vector<1x1x128xf32>
    tpu.vector_store %arg6[%c0_36, %c0_37, %c0_38], %57 {strides = array<i32>} : memref<1x1x128xf32, #tpu.memory_space<vmem>>, vector<1x1x128xf32>,
    return
  }
  func.func @transform_0(%arg0: i32) -> (i32, i32) {
    %c0_i32 = arith.constant 0 : i32
    %c0_i32_0 = arith.constant 0 : i32
    return %arg0, %c0_i32 : i32, i32
  }
  func.func @transform_1(%arg0: i32) -> (i32, i32) {
    %c0_i32 = arith.constant 0 : i32
    %c0_i32_0 = arith.constant 0 : i32
    return %arg0, %c0_i32 : i32, i32
  }
  func.func @transform_2(%arg0: i32) -> (i32, i32) {
    %c0_i32 = arith.constant 0 : i32
    %c0_i32_0 = arith.constant 0 : i32
    %c0_i32_1 = arith.constant 0 : i32
    return %c0_i32, %c0_i32_0 : i32, i32
  }
  func.func @transform_3(%arg0: i32) -> (i32, i32) {
    %c0_i32 = arith.constant 0 : i32
    %c0_i32_0 = arith.constant 0 : i32
    %c0_i32_1 = arith.constant 0 : i32
    return %c0_i32, %c0_i32_0 : i32, i32
  }
  func.func @transform_4(%arg0: i32) -> (i32, i32, i32) {
    %c0_i32 = arith.constant 0 : i32
    %c0_i32_0 = arith.constant 0 : i32
    %c0_i32_1 = arith.constant 0 : i32
    return %arg0, %c0_i32, %c0_i32_0 : i32, i32, i32
  }
  func.func @transform_5(%arg0: i32) -> (i32, i32, i32) {
    %c0_i32 = arith.constant 0 : i32
    %c0_i32_0 = arith.constant 0 : i32
    %c0_i32_1 = arith.constant 0 : i32
    return %arg0, %c0_i32, %c0_i32_0 : i32, i32, i32
  }
}

</mosaic_0001>

<bundles_post_ra>
// kernel: tpu_custom_call.1
= control target key start
LH: loop header
LB: loop body
LE: loop exit
PB: predicated region body
PF: predicated region fallthrough
CT: control target
= control target key end

     0   :  { %11 = vsyncpa [#allocation5], 0  ;;  %s401_s0 = inlined_call_operand.hbm [shape: f32[8,128], index: 0, kind: input, shape index: {}]   ;;  %s402_s1 = inlined_call_operand.hbm [shape: s16[8,16], index: 1, kind: input, shape index: {}]   ;;  %s403_s2 = inlined_call_operand.vmem [shape: f32[1,128], index: 2, kind: input, shape index: {}]   ;;  %s404_s3 = inlined_call_operand.vmem [shape: bf16[16,128], index: 3, kind: input, shape index: {}]   ;;  %s405_s4 = inlined_call_operand.hbm [shape: f32[1,1,128], index: 4, kind: output, shape index: {0}]   ;;  %s406_s5 = inlined_call_operand.hbm [shape: f32[1,1,128], index: 5, kind: output, shape index: {1}]  }
   0x1   :  { %12 = vsyncpa [#allocation8], 0 }
   0x2   :  { %13 = vsyncpa [#allocation6], 0 }
   0x3   :  { %14 = vsyncpa [#allocation11], 0  ;;  %s303_s18 = smov [#allocation4]   ;;  %s304_s20 = smov [#allocation7]  }
   0x4   :  { %s21_s19 = sshll.u32 %s303_s18, 4  ;;  %s31_s21 = sshll.u32 %s304_s20, 4  ;;  %s22_s19 = int_to_ptr.vmem [resolvable:$true] %s21_s19  ;;  %s32_s21 = int_to_ptr.vmem [resolvable:$true] %s31_s21 }
   0x5   :  { %s207_s24 = scalar_lea.hbm %s401_s0, 128 }
   0x6   :  { %p208_p0 = scmp.ne.s32.totalorder %s401_s0, %s207_s24  ;;  %p211_p1 = scmp.lt.u32.totalorder %s207_s24, %s401_s0 }
   0x8   :  { %p213_p2 = pnand %p211_p1, %p208_p0 }
   0xa   :  { %216 = shalt.err (!%p213_p2)
}
   0xb   :  { %s217_s29 = scalar_lea.vmem %s22_s19, 128  ;;  %p222_p4 = scmp.lt.s32.totalorder %s22_s19, %s22_s19 }
   0xc   :  { %p218_p3 = scmp.ne.s32.totalorder %s22_s19, %s217_s29  ;;  %p223_p5 = scmp.lt.s32.totalorder %s217_s29, %s217_s29 }
   0xe   :  { %p224_p6 = por %p223_p5, %p222_p4 }
  0x10   :  { %p225_p7 = pnand %p224_p6, %p218_p3 }
  0x12   :  { %228 = shalt.err (!%p225_p7)
}
  0x13   :  { %24 = dma.hbm_to_vmem [thread:$0]  %s401_s0, 128, %s22_s19, [#allocation5]  }
  0x14   :  { %s229_s9 = scalar_lea.hbm %s402_s1, 64 }
  0x15   :  { %p230_p8 = scmp.ne.s32.totalorder %s402_s1, %s229_s9  ;;  %p233_p9 = scmp.lt.u32.totalorder %s229_s9, %s402_s1 }
  0x17   :  { %p235_p10 = pnand %p233_p9, %p230_p8 }
  0x19   :  { %238 = shalt.err (!%p235_p10)
}
  0x1a   :  { %s239_s14 = scalar_lea.vmem %s32_s21, 64  ;;  %p244_p12 = scmp.lt.s32.totalorder %s32_s21, %s32_s21 }
  0x1b   :  { %p240_p11 = scmp.ne.s32.totalorder %s32_s21, %s239_s14  ;;  %p245_p13 = scmp.lt.s32.totalorder %s239_s14, %s239_s14 }
  0x1d   :  { %p246_p0 = por %p245_p13, %p244_p12 }
  0x1f   :  { %p247_p1 = pnand %p246_p0, %p240_p11 }
  0x21   :  { %250 = shalt.err (!%p247_p1)
}
  0x22   :  { %34 = dma.hbm_to_vmem [thread:$0]  %s402_s1, 64, %s32_s21, [#allocation8]  }
  0x23   :  { %295 = dma.done.wait [#allocation5], 128  }
  0x24   :  { %296 = vsyncadd [#allocation5], 4294967168 }
  0x25   :  { %297 = dma.done.wait [#allocation8], 64  }
  0x26   :  { %298 = vsyncadd [#allocation8], 4294967232  ;;  %v305_v0 = vmov 0.0   ;;  %vm306_vm0 = vmmov 0   ;;  %v204_v1 = vld [vmem:[%s404_s3] sm:$0xff]   ;;  %vm72_vm2 = vcmask 130048  }
  0x27   :  { %47 = vst [vmem:[#allocation2] sm:$0x1] %v305_v0  ;;  %48 = vst [vmem:[#allocation3] sm:$0x1] %v305_v0  ;;  %192 = vmatprep.subr.bf16.mxu0 %v305_v0  ;;  %194 = vmatprep.mubr.msk.bf16.mxu0 %vm306_vm0, %v305_v0  ;;  %v50_v2 = vld [vmem:[#allocation7] sm:$0xf] }
  0x28   :  { %193 = vmatpush3.bf16.msra.mxu0 %v204_v1  ;;  %v51_v3 = vunpack.c.l.b16 %v50_v2  ;;  %v49_v7 = vld [vmem:[#allocation4] sm:$0xff]  ;;  %v188_v14 = vld [vmem:[%s403_s2] ss:$0 sm:$0xff]  ;;  %s307_s2 = smov [#allocation9]   ;;  %s308_s19 = smov [#allocation10]  }
  0x29   :  { %v126_v8 = vadd.f32 1e-16, %v49_v7  ;;  %v124_v10 = vsub.f32 1.0, %v49_v7  ;;  %s162_s3 = sshll.u32 %s307_s2, 4  ;;  %s172_s20 = sshll.u32 %s308_s19, 4  ;;  %s163_s3 = int_to_ptr.vmem [resolvable:$true] %s162_s3  ;;  %s369_s20 = int_to_ptr.vmem [resolvable:$true] %s172_s20 }
  0x2a   :  { %vm54_vm1 = vcmp.eq.s32.totalorder %v51_v3, 4294967196  ;;  %v61_v4 = vcvt.s32.f32 %v51_v3  ;;  %s251_s21 = scalar_lea.vmem %s163_s3, 16  ;;  %s255_s22 = scalar_lea.vmem %s163_s3, 32 }
  0x2b   :  { %205 = vlog2.f32 %v126_v8  ;;  %v125_v12 = vmul.f32 %v124_v10, %v124_v10  ;;  %p252_p2 = scmp.ne.s32.totalorder %s163_s3, %s251_s21  ;;  %p256_p3 = scmp.lt.s32.totalorder %s163_s3, %s163_s3 }
  0x2c   :  { %v62_v5 = vsel %vm54_vm1, 1048576.0, %v61_v4  ;;  %p257_p4 = scmp.lt.s32.totalorder %s255_s22, %s251_s21 }
  0x2d   :  { %v63_v6 = vpack.c.bf16 %v62_v5, %v62_v5 }
  0x2e   :  { %v131_v32 = vld [vmem:[#allocation2] sm:$0x1]  ;;  %v141_v33 = vld [vmem:[#allocation3] sm:$0x1]  ;;  %p258_p5 = por %p257_p4, %p256_p3 }
  0x2f   :  { %195 = vmatmul.mubr.msk.bf16.vlgmr.msra.gmra.mrb[0].mxu0 %vm72_vm2, %v63_v6 }
  0x30   :  { %p259_p6 = pnand %p258_p5, %p252_p2 }
  0x35   :  { %v206_v9 = vpop.eup %205 }
  0x36   :  { %v128_v11 = vmul.f32 0.6931472, %v206_v9 }
  0x38   :  { %v129_v13 = vsub.f32 0.0, %v128_v11 }
  0x3a   :  { %v130_v15 = vmul.f32 %v129_v13, %v125_v12 }
 0x102   :  { %v110_v16 = vpop.f32.mrb[0].mxu0 }
 0x103   :  { %vm123_vm3 = vcmp.eq.f32.partialorder %v110_v16, %v188_v14  ;;  %v196_v17 = vpop.f32.mrb[1].mxu0 }
 0x104   :  { %v132_v18 = vsel %vm123_vm3, %v130_v15, 0.0  ;;  %v189_v19 = vsel %vm123_vm3, 1.0, %v305_v0  ;;  %v113_v20 = vpop.f32.mrb[2].mxu0 }
 0x105   :  { %v133_v21 = vrot.slane %v132_v18, 4  ;;  %v144_v22 = vrot.slane %v189_v19, 4  ;;  %v197_v23 = vpop.f32.mrb[3].mxu0 }
 0x107   :  { %v134_v24 = vadd.f32 %v133_v21, %v132_v18  ;;  %v145_v25 = vadd.f32 %v189_v19, %v144_v22 }
 0x109   :  { %v135_v26 = vrot.slane %v134_v24, 2  ;;  %v146_v27 = vrot.slane %v145_v25, 2 }
 0x10b   :  { %v136_v28 = vadd.f32 %v135_v26, %v134_v24  ;;  %v147_v29 = vadd.f32 %v146_v27, %v145_v25 }
 0x10d   :  { %v137_v30 = vrot.slane %v136_v28, 1  ;;  %v148_v31 = vrot.slane %v147_v29, 1 }
 0x10f   :  { %v138_v34 = vadd.f32 %v137_v30, %v136_v28  ;;  %v149_v35 = vadd.f32 %v148_v31, %v147_v29 }
 0x111   :  { %v139_v36 = vadd.f32 %v138_v34, %v131_v32  ;;  %v150_v37 = vadd.f32 %v149_v35, %v141_v33 }
 0x113   :  { %140 = vst [vmem:[#allocation2] sm:$0x1] %v139_v36  ;;  %151 = vst [vmem:[#allocation3] sm:$0x1] %v150_v37 }
 0x11a   :  { %v152_v38 = vld [vmem:[#allocation2] sm:$0x1]  ;;  %v154_v39 = vld [vmem:[#allocation3] sm:$0x1] }
 0x11b   :  { %153 = vst [vmem:[#allocation9] sm:$0x1] %v152_v38  ;;  %155 = vst [vmem:[#allocation10] sm:$0x1] %v154_v39 }
 0x11c   :  { %262 = shalt.err (!%p259_p6)
}
 0x11d   :  { %s263_s25 = scalar_lea.hbm %s405_s4, 16 }
 0x11e   :  { %p264_p7 = scmp.ne.s32.totalorder %s405_s4, %s263_s25  ;;  %p267_p8 = scmp.lt.u32.totalorder %s263_s25, %s405_s4 }
 0x120   :  { %p269_p9 = pnand %p267_p8, %p264_p7 }
 0x122   :  { %272 = shalt.err (!%p269_p9)
}
 0x123   :  { %165 = dma.vmem_to_hbm [thread:$0]  %s163_s3, 16, %s405_s4, [#allocation6]  }
 0x124   :  { %s273_s7 = scalar_lea.vmem %s369_s20, 16  ;;  %s277_s8 = scalar_lea.vmem %s369_s20, 32 }
 0x125   :  { %p274_p10 = scmp.ne.s32.totalorder %s369_s20, %s273_s7  ;;  %p278_p11 = scmp.lt.s32.totalorder %s369_s20, %s369_s20 }
 0x126   :  { %p279_p12 = scmp.lt.s32.totalorder %s277_s8, %s273_s7 }
 0x128   :  { %p280_p13 = por %p279_p12, %p278_p11 }
 0x12a   :  { %p281_p0 = pnand %p280_p13, %p274_p10 }
 0x12c   :  { %284 = shalt.err (!%p281_p0)
}
 0x12d   :  { %s285_s11 = scalar_lea.hbm %s406_s5, 16 }
 0x12e   :  { %p286_p1 = scmp.ne.s32.totalorder %s406_s5, %s285_s11  ;;  %p289_p2 = scmp.lt.u32.totalorder %s285_s11, %s406_s5 }
 0x130   :  { %p291_p3 = pnand %p289_p2, %p286_p1 }
 0x132   :  { %294 = shalt.err (!%p291_p3)
}
 0x133   :  { %175 = dma.vmem_to_hbm [thread:$0]  %s369_s20, 16, %s406_s5, [#allocation11]  }
 0x134   :  { %299 = dma.done.wait [#allocation6], 16  }
 0x135   :  { %300 = vsyncadd [#allocation6], 4294967280 }
 0x136   :  { %301 = dma.done.wait [#allocation11], 16  }
 0x137   :  { %302 = vsyncadd [#allocation11], 4294967280 }
 0x138   :  { %182 = vsyncpa [#allocation5], 1 }
 0x139   :  { %183 = vsyncpa [#allocation8], 1 }
 0x13a   :  { %184 = vsyncpa [#allocation6], 1 }
 0x13b   :  { %185 = vsyncpa [#allocation11], 1 }

</bundles_post_ra>
